<compile_context>
chip_gen: v7x
topology: tpu7x:2x2x1
jax: 0.10.0
libtpu: 0.0.40
codegen_flags: <defaults>
</compile_context>

<pallas_src>
import functools
import math

import numpy as np
import jax
import jax.numpy as jnp
from jax import lax
from jax.experimental import pallas as pl
from jax.experimental.pallas import tpu as pltpu


# ---------------------------------------------------------------------------
# Fused kernel: one grid step == one batch element
#   QKV = Wstack @ x + bstack          (3C, L)  one MXU matmul, f32 accumulate
#   S   = Q @ K^T   (trans-B dot)      (C, C)   Q pre-scaled by 1/sqrt(C)
#   P   = softmax(S, axis=-1)                   f32 stats, EUP reciprocal
#   O   = P @ V                        (C, L)   lane-dense store along L
# ---------------------------------------------------------------------------
def _mic_attention_kernel(x_ref, w_ref, b_ref, o_ref, *, channels, mxu_dtype):
    C = channels
    # Cast to the MXU dtype in-kernel instead of a standalone HBM cast pass.
    x = x_ref[...].astype(mxu_dtype)                                   # (C, L)

    # Stacked projection: rows [0:C)=Wq/sqrt(C), [C:2C)=Wk, [2C:3C)=Wv.
    qkv = jnp.dot(w_ref[...], x, preferred_element_type=jnp.float32) + b_ref[...]
    q = qkv[0:C]            # (C, L), already scaled by 1/sqrt(C)
    k = qkv[C:2 * C]        # (C, L)
    v = qkv[2 * C:3 * C]    # (C, L)

    # Channel-attention scores: contract the last (L) axis of both operands
    # (trans-B form) -> (C, C); no second layout of x, no wrapper transpose.
    s = lax.dot_general(q.astype(mxu_dtype), k.astype(mxu_dtype),
                        (((1,), (1,)), ((), ())),
                        preferred_element_type=jnp.float32)

    # Softmax over the last axis; max/sum in f32, divide moved to the EUP.
    m = jnp.max(s, axis=-1, keepdims=True)
    p = jnp.exp(s - m)
    denom = jnp.sum(p, axis=-1, keepdims=True)
    p = p * pl.reciprocal(denom, approx=True)

    out = jnp.dot(p.astype(mxu_dtype), v.astype(mxu_dtype),
                  preferred_element_type=jnp.float32)                  # (C, L)
    o_ref[...] = out.astype(o_ref.dtype)


def microphone_attention(x, params, *, mxu_dtype=jnp.bfloat16, out_dtype=jnp.bfloat16):
    """Fused Pallas implementation of MicrophoneAttention.forward (eval semantics).

    x      : (B, C, L) float32, PyTorch NCL layout.
    params : dict with 1x1-conv weights 'wq','wk','wv' (C, C, 1) and biases
             'bq','bk','bv' (C,).
    """
    B, C, L = x.shape
    inv_scale = 1.0 / math.sqrt(float(C))

    # Fold 1/sqrt(C) into the Q projection; stack the three projections so the
    # kernel does a single (3C, C) @ (C, L) matmul.
    wq = params["wq"][:, :, 0] * inv_scale
    wk = params["wk"][:, :, 0]
    wv = params["wv"][:, :, 0]
    w_stack = jnp.concatenate([wq, wk, wv], axis=0).astype(mxu_dtype)        # (3C, C)
    b_stack = jnp.concatenate(
        [params["bq"] * inv_scale, params["bk"], params["bv"]],
        axis=0).reshape(3 * C, 1).astype(jnp.float32)                        # (3C, 1)

    x_bytes = np.dtype(x.dtype).itemsize
    mxu_bytes = np.dtype(mxu_dtype).itemsize
    out_bytes = np.dtype(out_dtype).itemsize

    # Per-step VMEM working set (double-buffered blocks + intermediates); grows ~ L.
    vmem_est = (2 * C * L * x_bytes                       # x block (double-buffered)
                + 2 * C * L * out_bytes                   # out block (double-buffered)
                + 2 * (3 * C * C * mxu_bytes + 3 * C * 4) # stacked weights + bias
                + 3 * C * L * 4                           # qkv f32
                + 3 * C * L * mxu_bytes                   # q/k/v MXU-dtype casts
                + 2 * C * C * 4                           # scores + probs f32
                + C * L * 4)                              # out f32 before store cast
    vmem_limit = min(max(int(1.5 * vmem_est) + (2 << 20), 16 << 20), 48 << 20)
    # TODO(synk): for very long L (roughly L > ~20k at C=64 on v7x's 64 MiB VMEM,
    # earlier on v5e's 16 MiB default scoped limit) switch to an L-tiled two-pass /
    # online-softmax variant instead of a single per-batch slab.

    flops = 10 * B * C * C * L                            # proj (6) + scores (2) + PV (2)
    bytes_accessed = (B * C * L * x_bytes + B * C * L * out_bytes
                      + 3 * C * C * mxu_bytes + 3 * C * 4)

    kernel = functools.partial(_mic_attention_kernel, channels=C, mxu_dtype=mxu_dtype)
    batch_blk = pl.BlockSpec((pl.Squeezed(), C, L), lambda b: (b, 0, 0))

    return pl.pallas_call(
        kernel,
        out_shape=jax.ShapeDtypeStruct((B, C, L), out_dtype),
        grid=(B,),
        in_specs=[batch_blk,
                  pl.BlockSpec((3 * C, C), lambda b: (0, 0)),
                  pl.BlockSpec((3 * C, 1), lambda b: (0, 0))],
        out_specs=batch_blk,
        compiler_params=pltpu.CompilerParams(
            dimension_semantics=("parallel",),
            vmem_limit_bytes=vmem_limit),
        cost_estimate=pl.CostEstimate(flops=flops,
                                      transcendentals=B * C * C,
                                      bytes_accessed=bytes_accessed),
    )(x, w_stack, b_stack)


# ---------------------------------------------------------------------------
# Pure-JAX reference (f32) and deterministic synthetic parameters
# ---------------------------------------------------------------------------
def microphone_attention_ref(x, params):
    wq = params["wq"][:, :, 0]
    wk = params["wk"][:, :, 0]
    wv = params["wv"][:, :, 0]
    q = jnp.einsum("oi,bil->bol", wq, x) + params["bq"][None, :, None]
    k = jnp.einsum("oi,bil->bol", wk, x) + params["bk"][None, :, None]
    v = jnp.einsum("oi,bil->bol", wv, x) + params["bv"][None, :, None]
    s = jnp.einsum("bil,bjl->bij", q, k) / jnp.sqrt(jnp.float32(x.shape[1]))
    p = jax.nn.softmax(s, axis=-1)
    return jnp.einsum("bij,bjl->bil", p, v)


def init_params(key, channels):
    ks = jax.random.split(key, 6)
    bound = 1.0 / math.sqrt(channels)      # PyTorch Conv1d default init range

    def u(k, shape):
        return jax.random.uniform(k, shape, jnp.float32, -bound, bound)

    return {
        "wq": u(ks[0], (channels, channels, 1)), "bq": u(ks[1], (channels,)),
        "wk": u(ks[2], (channels, channels, 1)), "bk": u(ks[3], (channels,)),
        "wv": u(ks[4], (channels, channels, 1)), "bv": u(ks[5], (channels,)),
    }


if __name__ == "__main__":
    key = jax.random.PRNGKey(0)
    kp, kx = jax.random.split(key)

    B, C, L = 2, 64, 128                    # channels=64 as in the SLAM model
    params = init_params(kp, C)
    x = jax.random.normal(kx, (B, C, L), dtype=jnp.float32)

    ref = microphone_attention_ref(x, params)

    # Default fast path: bf16 MXU operands, bf16 output.
    fwd = jax.jit(microphone_attention)
    out = fwd(x, params)
    jax.block_until_ready(out)
    assert out.shape == (B, C, L)
    assert bool(jnp.all(jnp.isfinite(out)))
    max_err = float(jnp.max(jnp.abs(out.astype(jnp.float32) - ref)))
    assert max_err < 5e-2, f"bf16 path mismatch vs reference: max abs err = {max_err}"

    # f32 validation path (tighter tolerance; approx reciprocal still used).
    fwd_f32 = jax.jit(functools.partial(microphone_attention,
                                        mxu_dtype=jnp.float32,
                                        out_dtype=jnp.float32))
    out_f32 = fwd_f32(x, params)
    jax.block_until_ready(out_f32)
    max_err_f32 = float(jnp.max(jnp.abs(out_f32 - ref)))
    assert max_err_f32 < 1e-2, f"f32 path mismatch vs reference: max abs err = {max_err_f32}"

    print("KERNEL_OK")
</pallas_src>

<mosaic_0001>
module attributes {stable_mosaic.version = 11 : i64} {
  func.func @_mic_attention_kernel(%arg0: i32, %arg1: memref<1x64x128xf32, #tpu.memory_space<vmem>>, %arg2: memref<192x64xbf16, #tpu.memory_space<vmem>>, %arg3: memref<192x1xf32, #tpu.memory_space<vmem>>, %arg4: memref<1x64x128xbf16, #tpu.memory_space<vmem>>) attributes {dimension_semantics = [#tpu.dimension_semantics<parallel>], iteration_bounds = array<i64: 2>, scalar_prefetch = 0 : i64, scratch_operands = 0 : i64, tpu.core_type = #tpu.core_type<tc>, window_params = [{transform_indices = @transform_0, window_bounds = array<i64: 1, 64, 128>}, {pipeline_mode = #tpu.pipeline_mode<synchronous>, transform_indices = @transform_1, window_bounds = array<i64: 192, 64>}, {pipeline_mode = #tpu.pipeline_mode<synchronous>, transform_indices = @transform_2, window_bounds = array<i64: 192, 1>}, {transform_indices = @transform_3, window_bounds = array<i64: 1, 64, 128>}]} {
    %c0 = arith.constant 0 : index
    %c0_0 = arith.constant 0 : index
    %c0_1 = arith.constant 0 : index
    %0 = vector.load %arg1[%c0, %c0_0, %c0_1] : memref<1x64x128xf32, #tpu.memory_space<vmem>>, vector<1x64x128xf32>
    %1 = vector.shape_cast %0 : vector<1x64x128xf32> to vector<64x128xf32>
    %2 = arith.truncf %1 : vector<64x128xf32> to vector<64x128xbf16>
    %c0_2 = arith.constant 0 : index
    %c0_3 = arith.constant 0 : index
    %3 = vector.load %arg2[%c0_2, %c0_3] : memref<192x64xbf16, #tpu.memory_space<vmem>>, vector<192x64xbf16>
    %cst = arith.constant dense<0.000000e+00> : vector<192x128xf32>
    %4 = tpu.matmul %3, %2, %cst {dimension_numbers = #tpu.dot_dimension_numbers<[1], [0], [0], [1], [0, 0, 1, 1], [], []>} : vector<192x64xbf16>, vector<64x128xbf16>, vector<192x128xf32> -> vector<192x128xf32>
    %c0_4 = arith.constant 0 : index
    %c0_5 = arith.constant 0 : index
    %5 = vector.load %arg3[%c0_4, %c0_5] : memref<192x1xf32, #tpu.memory_space<vmem>>, vector<192x1xf32>
    %6 = vector.broadcast %5 : vector<192x1xf32> to vector<192x128xf32>
    %7 = arith.addf %4, %6 : vector<192x128xf32>
    %8 = vector.extract_strided_slice %7 {offsets = [0, 0], sizes = [64, 128], strides = [1, 1]} : vector<192x128xf32> to vector<64x128xf32>
    %9 = vector.extract_strided_slice %7 {offsets = [64, 0], sizes = [64, 128], strides = [1, 1]} : vector<192x128xf32> to vector<64x128xf32>
    %10 = vector.extract_strided_slice %7 {offsets = [128, 0], sizes = [64, 128], strides = [1, 1]} : vector<192x128xf32> to vector<64x128xf32>
    %11 = arith.truncf %8 : vector<64x128xf32> to vector<64x128xbf16>
    %12 = arith.truncf %9 : vector<64x128xf32> to vector<64x128xbf16>
    %cst_6 = arith.constant dense<0.000000e+00> : vector<64x64xf32>
    %13 = tpu.matmul %11, %12, %cst_6 {dimension_numbers = #tpu.dot_dimension_numbers<[1], [1], [0], [0], [0, 0, 1, 0], [], []>} : vector<64x128xbf16>, vector<64x128xbf16>, vector<64x64xf32> -> vector<64x64xf32>
    %cst_7 = arith.constant dense<0xFF800000> : vector<64xf32>
    %14 = vector.multi_reduction <maximumf>, %13, %cst_7 [1] : vector<64x64xf32> to vector<64xf32>
    %15 = vector.shape_cast %14 : vector<64xf32> to vector<64x1xf32>
    %16 = vector.broadcast %15 : vector<64x1xf32> to vector<64x64xf32>
    %17 = arith.subf %13, %16 : vector<64x64xf32>
    %18 = math.exp %17 : vector<64x64xf32>
    %cst_8 = arith.constant dense<0.000000e+00> : vector<64xf32>
    %19 = vector.multi_reduction <add>, %18, %cst_8 [1] : vector<64x64xf32> to vector<64xf32>
    %20 = vector.shape_cast %19 : vector<64xf32> to vector<64x1xf32>
    %21 = tpu.reciprocal %20 {approx = true} : vector<64x1xf32> -> vector<64x1xf32>
    %22 = vector.broadcast %21 : vector<64x1xf32> to vector<64x64xf32>
    %23 = arith.mulf %18, %22 : vector<64x64xf32>
    %24 = arith.truncf %23 : vector<64x64xf32> to vector<64x64xbf16>
    %25 = arith.truncf %10 : vector<64x128xf32> to vector<64x128xbf16>
    %cst_9 = arith.constant dense<0.000000e+00> : vector<64x128xf32>
    %26 = tpu.matmul %24, %25, %cst_9 {dimension_numbers = #tpu.dot_dimension_numbers<[1], [0], [0], [1], [0, 0, 1, 1], [], []>} : vector<64x64xbf16>, vector<64x128xbf16>, vector<64x128xf32> -> vector<64x128xf32>
    %27 = arith.truncf %26 : vector<64x128xf32> to vector<64x128xbf16>
    %c0_10 = arith.constant 0 : index
    %c0_11 = arith.constant 0 : index
    %c0_12 = arith.constant 0 : index
    %28 = vector.load %arg4[%c0_10, %c0_11, %c0_12] : memref<1x64x128xbf16, #tpu.memory_space<vmem>>, vector<1x64x128xbf16>
    %29 = vector.shape_cast %28 : vector<1x64x128xbf16> to vector<64x128xbf16>
    %30 = vector.shape_cast %27 : vector<64x128xbf16> to vector<1x64x128xbf16>
    tpu.vector_store %arg4[%c0_10, %c0_11, %c0_12], %30 {strides = array<i32>} : memref<1x64x128xbf16, #tpu.memory_space<vmem>>, vector<1x64x128xbf16>,
    return
  }
  func.func @transform_0(%arg0: i32) -> (i32, i32, i32) {
    %c0_i32 = arith.constant 0 : i32
    %c0_i32_0 = arith.constant 0 : i32
    %c0_i32_1 = arith.constant 0 : i32
    return %arg0, %c0_i32, %c0_i32_0 : i32, i32, i32
  }
  func.func @transform_1(%arg0: i32) -> (i32, i32) {
    %c0_i32 = arith.constant 0 : i32
    %c0_i32_0 = arith.constant 0 : i32
    %c0_i32_1 = arith.constant 0 : i32
    return %c0_i32, %c0_i32_0 : i32, i32
  }
  func.func @transform_2(%arg0: i32) -> (i32, i32) {
    %c0_i32 = arith.constant 0 : i32
    %c0_i32_0 = arith.constant 0 : i32
    %c0_i32_1 = arith.constant 0 : i32
    return %c0_i32, %c0_i32_0 : i32, i32
  }
  func.func @transform_3(%arg0: i32) -> (i32, i32, i32) {
    %c0_i32 = arith.constant 0 : i32
    %c0_i32_0 = arith.constant 0 : i32
    %c0_i32_1 = arith.constant 0 : i32
    return %arg0, %c0_i32, %c0_i32_0 : i32, i32, i32
  }
}

</mosaic_0001>

<bundles_post_ra>
// kernel: microphone_attention.1
= control target key start
LH: loop header
LB: loop body
LE: loop exit
PB: predicated region body
PF: predicated region fallthrough
CT: control target
= control target key end

     0   :  { %8 = vsyncpa [#allocation3], 0  ;;  %s1570_s0 = inlined_call_operand.vmem [shape: f32[2,64,128], index: 0, kind: input, shape index: {}]   ;;  %s1571_s1 = inlined_call_operand.vmem [shape: bf16[192,64], index: 1, kind: input, shape index: {}]   ;;  %s1572_s2 = inlined_call_operand.vmem [shape: f32[192,1], index: 2, kind: input, shape index: {}]   ;;  %s1573_s3 = inlined_call_operand.hbm [shape: bf16[2,64,128], index: 3, kind: output, shape index: {}]  }
   0x1   :  { %10 = vsyncpa [#allocation3 + $0x1], 0  ;;  %s1291_s12 = smov 0   ;;  %s1293_s13 = smov 0  }
   0x2   :  { %s1295_s14 = smov 0   ;;  %s1297_s15 = smov 0  }
   0x3 LB: > { %s1312_s16 = sadd.s32 4294967295, %s1265_s15   ;;  %s938_s17 = sadd.s32 4294967294, %s1265_s15   ;;  %s1265_s15 = sphi %s1297_s15, %s1579_s15   ;;  %s1261_s14 = sphi %s1295_s14, %s1578_s14   ;;  %s1257_s13 = sphi %s1293_s13, %s1577_s13   ;;  %s1253_s12 = sphi %s1291_s12, %s1576_s12  }
   0x4   : > { %s1316_s18 = sadd.s32 1, %s1265_s15   ;;  %s91_s19 = sadd.s32 1, %s1261_s14 }
   0x5   : > { %s88_s20 = ssub.s32 %s1265_s15, %s1316_s18  ;;  %p101_p0 = scmp.ne.s32.totalorder %s1261_s14, %s1257_s13 }
   0x6   : > { %p89_p1 = scmp.eq.s32.totalorder %s88_s20, 0  ;;  %p102_p2 = scmp.eq.s32.totalorder %s1312_s16, 1 }
   0x7   : > { %p107_p3 = scmp.ne.s32.totalorder %s1257_s13, %s1253_s12  ;;  %p108_p4 = scmp.eq.s32.totalorder %s938_s17, 1 }
   0x8   : > { %s1327_s21 = scalar_select %p89_p1, %s1261_s14, %s91_s19  }
   0x9   : > { %p1329_p5 = por %p102_p2, %p101_p0  ;;  %p1333_p6 = por %p108_p4, %p107_p3 }
   0xa   : > { %p941_p7 = scmp.ge.s32.totalorder %s1265_s15, 1  ;;  %p140_p8 = scmp.lt.s32.totalorder %s1265_s15, 3 }
   0xc   : > { %p141_p9 = pnand %p941_p7, %p140_p8 }
   0xd   : > { %p164_p10 = scmp.lt.s32.totalorder (!%p141_p9), %s1312_s16, 1  ;;  %v1159_v0 = vld [vmem:[%s1571_s1] sm:$0xff] (!%p141_p9)   ;;  %vm410_vm0 = vcmask (!%p141_p9), 523264   ;;  %v1267_v1 = vmov (!%p141_p9), 0   ;;  %v216_v14 = vld [vmem:[%s1572_s2 + $0x50] sm:$0xff] (!%p141_p9)  ;;  %v215_v15 = vld [vmem:[%s1572_s2 + $0x48] sm:$0xff] (!%p141_p9) }
   0xe   : > { %144 = sbr.rel (%p141_p9) target bundleno = 1133 (0x46d), region = 32  ;;  %1059 = vmatprep.mubr.msk.bf16.mxu0 (!%p141_p9), %vm410_vm0, %v1159_v0  ;;  %1157 = vset.pattern.permute.xlu0 (!%p141_p9), %v1267_v1  ;;  %v214_v13 = vld [vmem:[%s1572_s2 + $0x40] sm:$0xff] (!%p141_p9)  ;;  %v217_v17 = vld [vmem:[%s1572_s2 + $0x58] sm:$0xff] (!%p141_p9)  ;;  %v219_v19 = vld [vmem:[%s1572_s2 + $0x68] sm:$0xff] (!%p141_p9)  ;;  %s161_s29 = sand.u32 (!%p141_p9), 1, %s1257_s13  }
   0xf   : > { %1158 = vset.pattern.permute.xlu1 (!%p141_p9), %v1267_v1  ;;  %272 = vperm.xlu0 (!%p141_p9), %1157, %v214_v13   ;;  %v218_v18 = vld [vmem:[%s1572_s2 + $0x60] sm:$0xff] (!%p141_p9)  ;;  %v1160_v20 = vld [vmem:[%s1571_s1 + $0x8] sm:$0xff] (!%p141_p9)   ;;  %v1161_v21 = vld [vmem:[%s1571_s1 + $0x10] sm:$0xff] (!%p141_p9)   ;;  %s995_s6 = sshll.u32 (!%p141_p9), %s1312_s16, 9  ;;  %s1529_s10 = scalar_lea.sflag (!%p141_p9), [#allocation3], %s161_s29 }
  0x10   : > { %282 = vperm.xlu1 (!%p141_p9), %1158, %v216_v14   ;;  %v220_v22 = vld [vmem:[%s1572_s2 + $0x70] sm:$0xff] (!%p141_p9)  ;;  %v221_v23 = vld [vmem:[%s1572_s2 + $0x78] sm:$0xff] (!%p141_p9)  ;;  %v206_v24 = vld [vmem:[%s1572_s2] sm:$0xff] (!%p141_p9)  ;;  %s1527_s9 = scalar_lea.hbm (!%p141_p9), %s1573_s3, %s995_s6 }
  0x11   : > { %v207_v25 = vld [vmem:[%s1572_s2 + $0x8] sm:$0xff] (!%p141_p9)  ;;  %v1162_v26 = vld [vmem:[%s1571_s1 + $0x18] sm:$0xff] (!%p141_p9)   ;;  %v1163_v27 = vld [vmem:[%s1571_s1 + $0x20] sm:$0xff] (!%p141_p9)  }
  0x12   : > { %v208_v28 = vld [vmem:[%s1572_s2 + $0x10] sm:$0xff] (!%p141_p9)  ;;  %v209_v29 = vld [vmem:[%s1572_s2 + $0x18] sm:$0xff] (!%p141_p9)  ;;  %v210_v30 = vld [vmem:[%s1572_s2 + $0x20] sm:$0xff] (!%p141_p9) }
  0x13   : > { %277 = vperm.xlu0 (!%p141_p9), %1157, %v215_v15   ;;  %v211_v31 = vld [vmem:[%s1572_s2 + $0x28] sm:$0xff] (!%p141_p9)  ;;  %v1165_v33 = vld [vmem:[%s1571_s1 + $0x30] sm:$0xff] (!%p141_p9)   ;;  %v213_v35 = vld [vmem:[%s1572_s2 + $0x38] sm:$0xff] (!%p141_p9) }
  0x14   : > { %287 = vperm.xlu1 (!%p141_p9), %1158, %v217_v17   ;;  %v1164_v32 = vld [vmem:[%s1571_s1 + $0x28] sm:$0xff] (!%p141_p9)   ;;  %v212_v34 = vld [vmem:[%s1572_s2 + $0x30] sm:$0xff] (!%p141_p9)  ;;  %v222_v36 = vld [vmem:[%s1572_s2 + $0x80] sm:$0xff] (!%p141_p9) }
  0x15   : > { %s165_s26 = scalar_select %p164_p10, %s1312_s16, 1  ;;  %v1166_v37 = vld [vmem:[%s1571_s1 + $0x38] sm:$0xff]   ;;  %v1167_v38 = vld [vmem:[%s1571_s1 + $0x40] sm:$0xff]   ;;  %v1168_v39 = vld [vmem:[%s1571_s1 + $0x48] sm:$0xff]  }
  0x16   : > { %v1169_v40 = vld [vmem:[%s1571_s1 + $0x50] sm:$0xff]   ;;  %v1170_v41 = vld [vmem:[%s1571_s1 + $0x58] sm:$0xff]   ;;  %s1268_s16 = smov [#allocation2]  }
  0x17   : > { %s986_s27 = sshll.u32 %s165_s26, 6  ;;  %292 = vperm.xlu0 %1157, %v218_v18   ;;  %s1207_s17 = sshll.u32 %s1268_s16, 4  ;;  %s1208_s17 = int_to_ptr.vmem [resolvable:$false] %s1207_s17 }
  0x18   : > { %s168_s30 = scalar_lea.vmem %s1570_s0, %s986_s27  ;;  %297 = vperm.xlu1 %1158, %v219_v19   ;;  %s1209_s19 = scalar_lea.vmem %s1208_s17, 1024 }
  0x19   : > { %v170_v2 = vld [vmem:[%s168_s30] sm:$0xff]  ;;  %v171_v3 = vld [vmem:[%s168_s30 + $0x8] sm:$0xff]  ;;  %v172_v4 = vld [vmem:[%s168_s30 + $0x10] sm:$0xff] }
  0x1a   : > { %v178_v5 = vpack.c.bf16 %v171_v3, %v170_v2  ;;  %v173_v6 = vld [vmem:[%s168_s30 + $0x18] sm:$0xff]  ;;  %v174_v8 = vld [vmem:[%s168_s30 + $0x20] sm:$0xff]  ;;  %v175_v9 = vld [vmem:[%s168_s30 + $0x28] sm:$0xff] }
  0x1b   : > { %v179_v7 = vpack.c.bf16 %v173_v6, %v172_v4  ;;  %v180_v10 = vpack.c.bf16 %v175_v9, %v174_v8  ;;  %v176_v11 = vld [vmem:[%s168_s30 + $0x30] sm:$0xff]  ;;  %v177_v12 = vld [vmem:[%s168_s30 + $0x38] sm:$0xff]  ;;  %302 = vperm.xlu0 %1157, %v220_v22   ;;  %s942_s30 = sshll.u32 %s161_s29, 5 }
  0x1c   : > { %1051 = vmatprep.subr.bf16.mxu0 %v178_v5  ;;  %v181_v16 = vpack.c.bf16 %v177_v12, %v176_v11  ;;  %307 = vperm.xlu1 %1158, %v221_v23   ;;  %s163_s4 = scalar_lea.vmem [#allocation2], %s942_s30 }
  0x1d   : > { %1052 = vmatpush3.bf16.msra.mxu0 %v178_v5  ;;  %s876_s5 = sshll.u32 %s163_s4, 4  ;;  %s1522_s5 = int_to_ptr.vmem [resolvable:$true] %s876_s5 }
  0x1e   : > { %1053 = vmatprep.subr.bf16.mxu0 %v179_v7  ;;  %s1203_s11 = scalar_lea.vmem %s1522_s5, 512  ;;  %p1210_p0 = scmp.lt.s32.totalorder %s1522_s5, %s1208_s17 }
  0x1f   : > { %232 = vperm.xlu0 %1157, %v206_v24   ;;  %p1204_p11 = scmp.ne.s32.totalorder %s1522_s5, %s1203_s11  ;;  %p1211_p1 = scmp.lt.s32.totalorder %s1209_s19, %s1203_s11 }
  0x20   : > { %237 = vperm.xlu1 %1158, %v207_v25  }
  0x21   : > { %1054 = vmatpush3.bf16.msra.mxu0 %v179_v7  ;;  %p1205_p12 = pnand %p1204_p11, %p1329_p5  ;;  %p1212_p2 = por %p1211_p1, %p1210_p0 }
  0x22   : > { %1055 = vmatprep.subr.bf16.mxu0 %v180_v10 }
  0x23   : > { %242 = vperm.xlu0 %1157, %v208_v28   ;;  %p1206_p13 = pneg %p1205_p12 }
  0x24   : > { %247 = vperm.xlu1 %1158, %v209_v29  }
  0x25   : > { %1056 = vmatpush3.bf16.msra.mxu0 %v180_v10  ;;  %p1213_p3 = pnand %p1212_p2, %p1206_p13 }
  0x26   : > { %1057 = vmatprep.subr.bf16.mxu0 %v181_v16 }
  0x27   : > { %252 = vperm.xlu0 %1157, %v210_v30  }
  0x28   : > { %257 = vperm.xlu1 %1158, %v211_v31  }
  0x29   : > { %1058 = vmatpush3.bf16.msra.mxu0 %v181_v16 }
  0x2b   : > { %262 = vperm.xlu0 %1157, %v212_v34  }
  0x2c   : > { %1060 = vmatmul.mubr.msk.bf16.vlgmr.msra.gmra.mrb[0].mxu0 %vm410_vm0, %v1160_v20  ;;  %267 = vperm.xlu1 %1158, %v213_v35  }
  0x2d   : > { %1063 = vmatprep.mubr.msk.bf16.mxu0 %vm410_vm0, %v1161_v21 }
  0x30   : > { %312 = vperm.xlu1 %1158, %v222_v36  }
  0x34   : > { %1064 = vmatmul.mubr.msk.bf16.gmra.mrb[4].mxu0 %vm410_vm0, %v1162_v26 }
  0x35   : > { %1067 = vmatprep.mubr.msk.bf16.mxu0 %vm410_vm0, %v1163_v27 }
  0x3c   : > { %1068 = vmatmul.mubr.msk.bf16.gmra.mrb[8].mxu0 %vm410_vm0, %v1164_v32 }
  0x3d   : > { %1071 = vmatprep.mubr.msk.bf16.mxu0 %vm410_vm0, %v1165_v33 }
  0x44   : > { %1072 = vmatmul.mubr.msk.bf16.gmra.mrb[12].mxu0 %vm410_vm0, %v1166_v37 }
  0x45   : > { %1075 = vmatprep.mubr.msk.bf16.mxu0 %vm410_vm0, %v1167_v38 }
  0x4c   : > { %1076 = vmatmul.mubr.msk.bf16.gmra.mrb[16].mxu0 %vm410_vm0, %v1168_v39 }
  0x4d   : > { %1079 = vmatprep.mubr.msk.bf16.mxu0 %vm410_vm0, %v1169_v40 }
  0x54   : > { %1080 = vmatmul.mubr.msk.bf16.gmra.mrb[20].mxu0 %vm410_vm0, %v1170_v41 }
  0x8e   : > { %v273_v42 = vpop.permute.xlu0 %272 }
  0x8f   : > { %v283_v43 = vpop.permute.xlu1 %282 }
  0x92   : > { %v278_v44 = vpop.permute.xlu0 %277 }
  0x93   : > { %v288_v45 = vpop.permute.xlu1 %287 }
  0x96   : > { %v293_v46 = vpop.permute.xlu0 %292 }
  0x97   : > { %v298_v47 = vpop.permute.xlu1 %297 }
  0x9a   : > { %v303_v48 = vpop.permute.xlu0 %302 }
  0x9b   : > { %v308_v49 = vpop.permute.xlu1 %307 }
  0x9e   : > { %v233_v50 = vpop.permute.xlu0 %232 }
  0x9f   : > { %v238_v51 = vpop.permute.xlu1 %237 }
  0xa2   : > { %v243_v52 = vpop.permute.xlu0 %242 }
  0xa3   : > { %v248_v53 = vpop.permute.xlu1 %247 }
  0xa6   : > { %v253_v56 = vpop.permute.xlu0 %252 }
  0xa7   : > { %v258_v58 = vpop.permute.xlu1 %257 }
  0xaa   : > { %v263_v2 = vpop.permute.xlu0 %262 }
  0xab   : > { %v268_v4 = vpop.permute.xlu1 %267 }
  0xff   : > { %v1061_v54 = vpop.f32.mrb[0].mxu0 }
 0x100   : > { %v481_v55 = vpop.f32.mrb[1].mxu0  ;;  %v490_v59 = vadd.f32 %v1061_v54, %v243_v52  ;;  %v224_v52 = vld [vmem:[%s1572_s2 + $0x90] sm:$0xff]  ;;  %v226_v54 = vld [vmem:[%s1572_s2 + $0xa0] sm:$0xff] }
 0x101   : > { %v1062_v57 = vpop.f32.mrb[2].mxu0  ;;  %v482_v62 = vadd.f32 %v481_v55, %v233_v50 }
 0x102   : > { %v493_v60 = vadd.f32 %v1062_v57, %v248_v53  ;;  %v484_v61 = vpop.f32.mrb[3].mxu0  ;;  %v225_v53 = vld [vmem:[%s1572_s2 + $0x98] sm:$0xff] }
 0x103   : > { %v485_v63 = vadd.f32 %v484_v61, %v238_v51 }
 0x104   : > { %v577_v0 = vpack.c.bf16 %v493_v60, %v490_v59  ;;  %v313_v60 = vpop.permute.xlu1 %312 }
 0x105   : > { %v576_v1 = vpack.c.bf16 %v485_v63, %v482_v62 }
 0x107   : > { %v1065_v3 = vpop.f32.mrb[4].mxu0  ;;  %1091 = vmatprep.mubr.bf16.mxu1 %v576_v1 }
 0x108   : > { %v497_v5 = vpop.f32.mrb[5].mxu0  ;;  %v506_v7 = vadd.f32 %v1065_v3, %v263_v2 }
 0x109   : > { %v1066_v6 = vpop.f32.mrb[6].mxu0  ;;  %v498_v10 = vadd.f32 %v497_v5, %v253_v56  ;;  %v223_v56 = vld [vmem:[%s1572_s2 + $0x88] sm:$0xff] }
 0x10a   : > { %v509_v8 = vadd.f32 %v1066_v6, %v268_v4  ;;  %v500_v9 = vpop.f32.mrb[7].mxu0 }
 0x10b   : > { %v501_v11 = vadd.f32 %v500_v9, %v258_v58 }
 0x10c   : > { %v579_v12 = vpack.c.bf16 %v509_v8, %v506_v7 }
 0x10d   : > { %v578_v13 = vpack.c.bf16 %v501_v11, %v498_v10 }
 0x10f   : > { %v1069_v14 = vpop.f32.mrb[8].mxu0 }
 0x110   : > { %v513_v15 = vpop.f32.mrb[9].mxu0  ;;  %v522_v17 = vadd.f32 %v1069_v14, %v283_v43 }
 0x111   : > { %v1070_v16 = vpop.f32.mrb[10].mxu0  ;;  %v514_v20 = vadd.f32 %v513_v15, %v273_v42 }
 0x112   : > { %v525_v18 = vadd.f32 %v1070_v16, %v288_v45  ;;  %v516_v19 = vpop.f32.mrb[11].mxu0 }
 0x113   : > { %v517_v21 = vadd.f32 %v516_v19, %v278_v44 }
 0x114   : > { %v581_v22 = vpack.c.bf16 %v525_v18, %v522_v17 }
 0x115   : > { %v580_v23 = vpack.c.bf16 %v517_v21, %v514_v20 }
 0x117   : > { %v1073_v24 = vpop.f32.mrb[12].mxu0  ;;  %1083 = vmatprep.subr.bf16.mxu1 %v580_v23 }
 0x118   : > { %v529_v25 = vpop.f32.mrb[13].mxu0  ;;  %1084 = vmatpush3.bf16.xpose.msra.mxu1 %v580_v23  ;;  %v538_v27 = vadd.f32 %v1073_v24, %v303_v48 }
 0x119   : > { %v1074_v26 = vpop.f32.mrb[14].mxu0  ;;  %1085 = vmatprep.subr.bf16.mxu1 %v581_v22  ;;  %v530_v30 = vadd.f32 %v529_v25, %v293_v46 }
 0x11a   : > { %v541_v28 = vadd.f32 %v1074_v26, %v308_v49  ;;  %v532_v29 = vpop.f32.mrb[15].mxu0 }
 0x11b   : > { %v533_v31 = vadd.f32 %v532_v29, %v298_v47 }
 0x11c   : > { %v583_v32 = vpack.c.bf16 %v541_v28, %v538_v27 }
 0x11d   : > { %v582_v33 = vpack.c.bf16 %v533_v31, %v530_v30 }
 0x11f   : > { %v1443_v34 = vpop.f32.mrb[16].mxu0 }
 0x120   : > { %v1445_v35 = vpop.f32.mrb[17].mxu0  ;;  %1086 = vmatpush3.bf16.xpose.msra.mxu1 %v581_v22 }
 0x121   : > { %1087 = vmatprep.subr.bf16.mxu1 %v582_v33  ;;  %v1078_v55 = vpop.f32.mrb[18].mxu0 }
 0x122   : > { %v548_v57 = vpop.f32.mrb[19].mxu0 }
 0x127   : > { %v1470_v58 = vpop.f32.mrb[20].mxu0 }
 0x128   : > { %1088 = vmatpush3.bf16.xpose.msra.mxu1 %v582_v33  ;;  %v1472_v59 = vpop.f32.mrb[21].mxu0 }
 0x129   : > { %1089 = vmatprep.subr.bf16.mxu1 %v583_v32 }
 0x130   : > { %1090 = vmatpush3.bf16.xpose.msra.mxu1 %v583_v32  ;;  %v546_v32 = vadd.f32 %v1445_v35, %v313_v60  ;;  %v228_v35 = vld [vmem:[%s1572_s2 + $0xb0] sm:$0xff] }
 0x137   : > { %1092 = vmatmul.mubr.bf16.vlgmr.msra.gmra.mrb[0].mxu1 %v577_v0 }
 0x138   : > { %1095 = vmatprep.mubr.bf16.mxu1 %v578_v13 }
 0x13f   : > { %1096 = vmatmul.mubr.bf16.gmra.mrb[4].mxu1 %v579_v12 }
 0x20a   : > { %v1093_v36 = vpop.f32.mrb[0].mxu1 }
 0x20b   : > { %v618_v37 = vpop.f32.mrb[1].mxu1  ;;  %v655_v38 = vsel %vm410_vm0, %v1093_v36, -inf }
 0x20c   : > { %656 = vmax.xlane.f32.xlu0 %v655_v38  ;;  %v1094_v39 = vpop.f32.mrb[2].mxu1  ;;  %v649_v42 = vsel %vm410_vm0, %v618_v37, -inf }
 0x20d   : > { %v621_v40 = vpop.f32.mrb[3].mxu1  ;;  %v658_v45 = vsel %vm410_vm0, %v1094_v39, -inf }
 0x20e   : > { %v652_v41 = vsel %vm410_vm0, %v621_v40, -inf }
 0x20f   : > { %653 = vmax.xlane.f32.xlu1 %v652_v41 }
 0x210   : > { %650 = vmax.xlane.f32.xlu0 %v649_v42 }
 0x212   : > { %v1097_v43 = vpop.f32.mrb[4].mxu1 }
 0x213   : > { %v634_v44 = vpop.f32.mrb[5].mxu1  ;;  %v667_v46 = vsel %vm410_vm0, %v1097_v43, -inf }
 0x214   : > { %659 = vmax.xlane.f32.xlu0 %v658_v45  ;;  %668 = vmax.xlane.f32.xlu1 %v667_v46  ;;  %v1098_v47 = vpop.f32.mrb[6].mxu1  ;;  %v661_v49 = vsel %vm410_vm0, %v634_v44, -inf  ;;  %v1082_v45 = vpop.f32.mrb[22].mxu0 }
 0x215   : > { %v1452_v48 = vpop.f32.mrb[7].mxu1  ;;  %v670_v50 = vsel %vm410_vm0, %v1098_v47, -inf  ;;  %v564_v46 = vpop.f32.mrb[23].mxu0 }
 0x216   : > { %v664_v51 = vsel %vm410_vm0, %v1452_v48, -inf }
 0x218   : > { %662 = vmax.xlane.f32.xlu1 %v661_v49  ;;  %671 = vmax.xlane.f32.xlu0 %v670_v50 }
 0x21c   : > { %665 = vmax.xlane.f32.xlu0 %v664_v51  ;;  %v229_v51 = vld [vmem:[%s1572_s2 + $0xb8] sm:$0xff] }
 0x229   : > { %322 = vperm.xlu1 %1158, %v224_v52  }
 0x22d   : > { %327 = vperm.xlu1 %1158, %v225_v53  }
 0x231   : > { %332 = vperm.xlu1 %1158, %v226_v54  }
 0x232   : > { %317 = vperm.xlu0 %1157, %v223_v56  }
 0x299   : > { %v657_v61 = vpop.xlane.xlu0 %656 }
 0x29a   : > { %v675_v62 = vsub.f32 %v1093_v36, %v657_v61 }
 0x29c   : > { %v685_v63 = vmul.f32 1.442695, %v675_v62  ;;  %v654_v0 = vpop.xlane.xlu1 %653 }
 0x29d   : > { %v651_v1 = vpop.xlane.xlu0 %650  ;;  %v674_v3 = vsub.f32 %v621_v40, %v654_v0 }
 0x29e   : > { %1171 = vpow2.f32 %v685_v63  ;;  %v673_v2 = vsub.f32 %v618_v37, %v651_v1 }
 0x29f   : > { %v683_v8 = vmul.f32 1.442695, %v674_v3 }
 0x2a0   : > { %v681_v4 = vmul.f32 1.442695, %v673_v2 }
 0x2a1   : > { %v660_v5 = vpop.xlane.xlu0 %659  ;;  %v669_v6 = vpop.xlane.xlu1 %668 }
 0x2a2   : > { %1173 = vpow2.f32 %v681_v4  ;;  %v676_v7 = vsub.f32 %v1094_v39, %v660_v5  ;;  %v679_v10 = vsub.f32 %v1097_v43, %v669_v6 }
 0x2a4   : > { %v687_v9 = vmul.f32 1.442695, %v676_v7  ;;  %v693_v14 = vmul.f32 1.442695, %v679_v10 }
 0x2a5   : > { %v663_v11 = vpop.xlane.xlu1 %662  ;;  %v672_v12 = vpop.xlane.xlu0 %671 }
 0x2a6   : > { %1175 = vpow2.f32 %v687_v9  ;;  %v677_v15 = vsub.f32 %v634_v44, %v663_v11  ;;  %v680_v20 = vsub.f32 %v1098_v47, %v672_v12  ;;  %v227_v47 = vld [vmem:[%s1572_s2 + $0xa8] sm:$0xff] }
 0x2a7   : > { %1177 = vpow2.f32 %v683_v8 }
 0x2a8   : > { %v1474_v13 = vpop.eup %1171  ;;  %1179 = vpow2.f32 %v693_v14  ;;  %v689_v19 = vmul.f32 1.442695, %v677_v15  ;;  %v695_v27 = vmul.f32 1.442695, %v680_v20 }
 0x2a9   : > { %v323_v16 = vpop.permute.xlu1 %322  ;;  %v703_v17 = vsel %vm410_vm0, %v1474_v13, 0.0  ;;  %v666_v21 = vpop.xlane.xlu0 %665 }
 0x2aa   : > { %704 = vadd.xlane.f32.xlu1 %v703_v17  ;;  %v554_v24 = vadd.f32 %v1443_v34, %v323_v16  ;;  %1181 = vpow2.f32 %v689_v19  ;;  %v678_v43 = vsub.f32 %v1452_v48, %v666_v21 }
 0x2ab   : > { %1183 = vpow2.f32 %v695_v27 }
 0x2ac   : > { %v1174_v18 = vpop.eup %1173  ;;  %v691_v44 = vmul.f32 1.442695, %v678_v43 }
 0x2ad   : > { %v328_v22 = vpop.permute.xlu1 %327  ;;  %v697_v23 = vsel %vm410_vm0, %v1174_v18, 0.0 }
 0x2ae   : > { %v557_v25 = vadd.f32 %v1078_v55, %v328_v22  ;;  %698 = vadd.xlane.f32.xlu1 %v697_v23  ;;  %1185 = vpow2.f32 %v691_v44 }
 0x2b0   : > { %v1480_v26 = vpop.eup %1175  ;;  %v742_v28 = vpack.c.bf16 %v557_v25, %v554_v24 }
 0x2b1   : > { %v318_v29 = vpop.permute.xlu0 %317  ;;  %v706_v30 = vsel %vm410_vm0, %v1480_v26, 0.0  ;;  %v1178_v31 = vpop.eup %1177 }
 0x2b2   : > { %v549_v33 = vadd.f32 %v548_v57, %v318_v29  ;;  %707 = vadd.xlane.f32.xlu0 %v706_v30  ;;  %v700_v34 = vsel %vm410_vm0, %v1178_v31, 0.0  ;;  %v1486_v37 = vpop.eup %1179  ;;  %v333_v52 = vpop.permute.xlu1 %332 }
 0x2b3   : > { %v715_v38 = vsel %vm410_vm0, %v1486_v37, 0.0  ;;  %v562_v3 = vadd.f32 %v1472_v59, %v333_v52 }
 0x2b4   : > { %v741_v36 = vpack.c.bf16 %v549_v33, %v546_v32  ;;  %v1490_v39 = vpop.eup %1181 }
 0x2b5   : > { %v709_v40 = vsel %vm410_vm0, %v1490_v39, 0.0  ;;  %v1497_v41 = vpop.eup %1183 }
 0x2b6   : > { %701 = vadd.xlane.f32.xlu0 %v700_v34  ;;  %1099 = vmatprep.subr.bf16.mxu1 %v741_v36  ;;  %v718_v42 = vsel %vm410_vm0, %v1497_v41, 0.0 }
 0x2b7   : > { %1100 = vmatpush3.bf16.msra.mxu1 %v741_v36 }
 0x2b8   : > { %1101 = vmatprep.subr.bf16.mxu1 %v742_v28  ;;  %v1186_v49 = vpop.eup %1185 }
 0x2b9   : > { %v712_v50 = vsel %vm410_vm0, %v1186_v49, 0.0 }
 0x2ba   : > { %716 = vadd.xlane.f32.xlu0 %v715_v38 }
 0x2bb   : > { %1102 = vmatpush3.bf16.msra.mxu1 %v742_v28 }
 0x2be   : > { %710 = vadd.xlane.f32.xlu0 %v709_v40 }
 0x2bf   : > { %342 = vperm.xlu1 %1158, %v228_v35  }
 0x2c2   : > { %719 = vadd.xlane.f32.xlu0 %v718_v42 }
 0x2d8   : > { %337 = vperm.xlu0 %1157, %v227_v47  }
 0x2e3   : > { %713 = vadd.xlane.f32.xlu1 %v712_v50 }
 0x2f4   : > { %347 = vperm.xlu1 %1158, %v229_v51  }
 0x337   : > { %v705_v48 = vpop.xlane.xlu1 %704 }
 0x33b   : > { %v699_v53 = vpop.xlane.xlu1 %698 }
 0x33c   : > { %1187 = vrcp.f32 %v699_v53 }
 0x33f   : > { %v708_v54 = vpop.xlane.xlu0 %707  ;;  %v343_v6 = vpop.permute.xlu1 %342 }
 0x340   : > { %v570_v10 = vadd.f32 %v1470_v58, %v343_v6 }
 0x343   : > { %v702_v55 = vpop.xlane.xlu0 %701 }
 0x344   : > { %1189 = vrcp.f32 %v702_v55 }
 0x345   : > { %1191 = vrcp.f32 %v708_v54 }
 0x346   : > { %v1188_v57 = vpop.eup %1187  ;;  %1193 = vrcp.f32 %v705_v48 }
 0x347   : > { %v717_v56 = vpop.xlane.xlu0 %716  ;;  %v729_v62 = vmul.f32 %v1188_v57, %v1174_v18 }
 0x34b   : > { %v711_v60 = vpop.xlane.xlu0 %710 }
 0x34c   : > { %1195 = vrcp.f32 %v711_v60 }
 0x34e   : > { %v1190_v61 = vpop.eup %1189 }
 0x34f   : > { %v730_v63 = vmul.f32 %v1190_v61, %v1178_v31  ;;  %v720_v1 = vpop.xlane.xlu0 %719  ;;  %v1192_v8 = vpop.eup %1191 }
 0x350   : > { %v1194_v12 = vpop.eup %1193  ;;  %v732_v59 = vmul.f32 %v1192_v8, %v1480_v26 }
 0x351   : > { %v737_v0 = vpack.c.bf16 %v730_v63, %v729_v62  ;;  %v731_v16 = vmul.f32 %v1194_v12, %v1474_v13 }
 0x353   : > { %1107 = vmatprep.mubr.msk.bf16.mxu1 %vm410_vm0, %v737_v0  ;;  %v738_v18 = vpack.c.bf16 %v732_v59, %v731_v16 }
 0x356   : > { %v1196_v15 = vpop.eup %1195 }
 0x357   : > { %v338_v2 = vpop.permute.xlu0 %337  ;;  %v733_v20 = vmul.f32 %v1196_v15, %v1490_v39 }
 0x358   : > { %v565_v4 = vadd.f32 %v564_v46, %v338_v2 }
 0x35a   : > { %v743_v5 = vpack.c.bf16 %v565_v4, %v562_v3 }
 0x35c   : > { %1103 = vmatprep.subr.bf16.mxu1 %v743_v5 }
 0x35d   : > { %1104 = vmatpush3.bf16.msra.mxu1 %v743_v5 }
 0x370   : > { %v714_v7 = vpop.xlane.xlu1 %713 }
 0x371   : > { %1197 = vrcp.f32 %v714_v7 }
 0x372   : > { %1199 = vrcp.f32 %v720_v1 }
 0x373   : > { %1201 = vrcp.f32 %v717_v56 }
 0x374   : > { %v348_v9 = vpop.permute.xlu1 %347 }
 0x375   : > { %v573_v11 = vadd.f32 %v1082_v45, %v348_v9 }
 0x377   : > { %v744_v14 = vpack.c.bf16 %v573_v11, %v570_v10 }
 0x379   : > { %1105 = vmatprep.subr.bf16.mxu1 %v744_v14 }
 0x37a   : > { %1106 = vmatpush3.bf16.msra.mxu1 %v744_v14 }
 0x37b   : > { %v1198_v17 = vpop.eup %1197 }
 0x37c   : > { %v1200_v19 = vpop.eup %1199  ;;  %v734_v21 = vmul.f32 %v1198_v17, %v1186_v49 }
 0x37d   : > { %1108 = vmatmul.mubr.msk.bf16.vlgmr.msra.gmra.mrb[8].mxu1 %vm410_vm0, %v738_v18  ;;  %v1202_v58 = vpop.eup %1201  ;;  %v736_v23 = vmul.f32 %v1200_v19, %v1497_v41 }
 0x37e   : > { %v739_v22 = vpack.c.bf16 %v734_v21, %v733_v20  ;;  %v735_v24 = vmul.f32 %v1202_v58, %v1486_v37 }
 0x380   : > { %1111 = vmatprep.mubr.msk.bf16.mxu1 %vm410_vm0, %v739_v22  ;;  %v740_v13 = vpack.c.bf16 %v736_v23, %v735_v24 }
 0x385   : > { %1112 = vmatmul.mubr.msk.bf16.gmra.mrb[12].mxu1 %vm410_vm0, %v740_v13 }
 0x450   : > { %v1109_v25 = vpop.f32.mrb[8].mxu1 }
 0x451   : > { %v791_v26 = vpop.f32.mrb[9].mxu1 }
 0x452   : > { %v1110_v27 = vpop.f32.mrb[10].mxu1 }
 0x453   : > { %v1004_v28 = vpack.c.bf16 %v1110_v27, %v1109_v25  ;;  %v794_v29 = vpop.f32.mrb[11].mxu1 }
 0x454   : > { %v999_v30 = vpack.c.bf16 %v794_v29, %v791_v26 }
 0x455   : > { %1016 = vst [vmem:[%s163_s4 + $0x8] sm:$0xff] %v1004_v28  }
 0x456   : > { %1000 = vst [vmem:[%s163_s4] sm:$0xff] %v999_v30  }
 0x458   : > { %v1113_v31 = vpop.f32.mrb[12].mxu1 }
 0x459   : > { %v807_v32 = vpop.f32.mrb[13].mxu1 }
 0x45a   : > { %v1114_v33 = vpop.f32.mrb[14].mxu1 }
 0x45b   : > { %v1014_v36 = vpack.c.bf16 %v1114_v33, %v1113_v31  ;;  %v810_v34 = vpop.f32.mrb[15].mxu1 }
 0x45c   : > { %v1009_v37 = vpack.c.bf16 %v810_v34, %v807_v32 }
 0x45d   : > { %1018 = vst [vmem:[%s163_s4 + $0x18] sm:$0xff] %v1014_v36  }
 0x45e   : > { %1017 = vst [vmem:[%s163_s4 + $0x10] sm:$0xff] %v1009_v37  }
 0x45f   : > { %1216 = shalt.err (!%p1213_p3)
}
 0x460   : > { %s1217_s20 = scalar_lea.hbm %s1527_s9, 512  ;;  %s1221_s26 = scalar_lea.hbm %s1573_s3, 1024 }
 0x461   : > { %p1218_p4 = scmp.ne.s32.totalorder %s1527_s9, %s1217_s20  ;;  %p1222_p9 = scmp.lt.u32.totalorder %s1527_s9, %s1573_s3 }
 0x462   : > { %p1223_p10 = scmp.lt.u32.totalorder %s1221_s26, %s1217_s20  ;;  %p1225_p12 = scmp.lt.u32.totalorder %s1217_s20, %s1527_s9 }
 0x463   : > { %p1219_p7 = pnand %p1218_p4, %p1329_p5 }
 0x464   : > { %p1224_p11 = por %p1223_p10, %p1222_p9 }
 0x465   : > { %p1220_p8 = pneg %p1219_p7 }
 0x466   : > { %p1226_p13 = por %p1225_p12, %p1224_p11 }
 0x468   : > { %p1227_p0 = pnand %p1226_p13, %p1220_p8 }
 0x46a   : > { %1230 = shalt.err (!%p1227_p0)
}
 0x46b   : > { %s1269_s29 = smov 64   ;;  %s1270_s30 = smov 4  }
 0x46c   : > { %1115 = dma.vmem_to_hbm [thread:$0]  (%p1329_p5), %s1522_s5, 512, %s1527_s9, %s1529_s10, %s1269_s29, %s1269_s29, %s1270_s30  }
 0x46d PF: > { %p1121_p1 = scmp.ge.s32.totalorder %s1265_s15, 2  ;;  %s891_s4 = sand.u32 1, %s1253_s12  }
 0x46e   : > { %s892_s6 = scalar_lea.sflag [#allocation3], %s891_s4 }
 0x46f   : > { %p1118_p2 = pnand %p1121_p1, %p1333_p6 }
 0x471   : > { %1248 = dma.done.wait (!%p1118_p2), %s892_s6, 512  }
 0x472   : > { %1250 = vsyncadd (!%p1118_p2), %s892_s6, 4294966784  ;;  %p13_p3 = scmp.ge.s32.totalorder %s1316_s18, 4   ;;  %s1576_s12 = smov %s1257_s13 }
 0x473   : > { %s1577_s13 = smov %s1261_s14  ;;  %s1578_s14 = smov %s1327_s21 }
 0x474   : > { %s1579_s15 = smov %s1316_s18  ;;  %15 = sbr.rel (!%p13_p3) target bundleno = 3 (0x3), region = 67 }
 0x47b   :  { %897 = vsyncpa [#allocation3], 1 }
 0x47c   :  { %899 = vsyncpa [#allocation3 + $0x1], 1 }

</bundles_post_ra>
